<compile_context>
chip_gen: v7x
topology: tpu7x:2x2x1
jax: 0.10.0
libtpu: 0.0.40
codegen_flags: <defaults>
</compile_context>

<pallas_src>
import functools

import jax
import jax.numpy as jnp
import numpy as np
from jax.experimental import pallas as pl
from jax.experimental.pallas import tpu as pltpu


def _round_up(x: int, m: int) -> int:
    return ((x + m - 1) // m) * m


def mtlr_kernel(x_ref, w_ref, b_ref, o_ref):
    # x_ref: (TN, F), w_ref: (F, Tp), b_ref: (1, Tp), o_ref: (TN, Tp)
    # Single MXU matmul with f32 accumulation + bias epilogue on the VPU.
    z = jnp.dot(x_ref[...], w_ref[...], preferred_element_type=jnp.float32)
    o_ref[...] = (z + b_ref[...]).astype(o_ref.dtype)


@functools.partial(jax.jit, static_argnames=("block_n",))
def mtlr_forward(x, weight, bias, G, *, block_n: int = 512):
    """x: (N, F); weight: (F, T); bias: (T,); G: (T, T) -> (N, T)."""
    N, F = x.shape
    T = weight.shape[1]

    # ---- Fold G into the parameters (tiny op outside the kernel).
    w_folded = jnp.dot(weight, G, preferred_element_type=jnp.float32)      # (F, T)
    b_folded = jnp.dot(bias.reshape(1, T), G,
                       preferred_element_type=jnp.float32)                  # (1, T)
    w_folded = w_folded.astype(weight.dtype)
    b_folded = b_folded.astype(bias.dtype)

    # ---- Pad time bins to a lane-dense multiple of 128 (unmasked stores).
    T_pad = _round_up(T, 128)
    if T_pad != T:
        w_folded = jnp.pad(w_folded, ((0, 0), (0, T_pad - T)))
        b_folded = jnp.pad(b_folded, ((0, 0), (0, T_pad - T)))

    # ---- Pad batch to a multiple of 8 (sublane) and pick the row-tile size.
    # block_n is a multiple of 8; sized so double-buffered x / out tiles plus
    # the resident W' stay well under the default scoped VMEM limit
    # (v7x: 32 MiB scoped of 64 MiB physical).
    N_pad = _round_up(N, 8)
    if N_pad != N:
        x = jnp.pad(x, ((0, N_pad - N), (0, 0)))
    tn = min(_round_up(block_n, 8), N_pad)
    grid = (pl.cdiv(N_pad, tn),)

    bytes_per = jnp.dtype(x.dtype).itemsize
    cost = pl.CostEstimate(
        flops=2 * N_pad * F * T_pad,
        transcendentals=0,
        bytes_accessed=(N_pad * F + F * T_pad + T_pad + N_pad * T_pad) * bytes_per,
    )

    out_padded = pl.pallas_call(
        mtlr_kernel,
        out_shape=jax.ShapeDtypeStruct((N_pad, T_pad), x.dtype),
        grid=grid,
        in_specs=[
            pl.BlockSpec((tn, F), lambda i: (i, 0)),        # x row tile (pipelined)
            pl.BlockSpec((F, T_pad), lambda i: (0, 0)),     # W' resident in VMEM
            pl.BlockSpec((1, T_pad), lambda i: (0, 0)),     # b' resident in VMEM
        ],
        out_specs=pl.BlockSpec((tn, T_pad), lambda i: (i, 0)),
        compiler_params=pltpu.CompilerParams(
            dimension_semantics=("parallel",),
        ),
        cost_estimate=cost,
    )(x, w_folded, b_folded)

    # Strip the lane / sublane padding.
    return out_padded[:N, :T]


def init_mtlr_params(key, in_features, num_time_bins, dtype=jnp.float32):
    """Deterministic init matching the PyTorch reset_parameters():
    xavier_normal_ for weight, zeros for bias, tril-ones buffer for G."""
    std = float(np.sqrt(2.0 / (in_features + num_time_bins)))
    weight = std * jax.random.normal(key, (in_features, num_time_bins), dtype=dtype)
    bias = jnp.zeros((num_time_bins,), dtype=dtype)
    G = jnp.tril(jnp.ones((num_time_bins, num_time_bins), dtype=dtype))
    return weight, bias, G


if __name__ == "__main__":
    in_features = 32
    num_time_bins = 8
    batch = 2

    key = jax.random.PRNGKey(0)
    k_w, k_x = jax.random.split(key)

    weight, bias, G = init_mtlr_params(k_w, in_features, num_time_bins)
    x = jax.random.normal(k_x, (batch, in_features), dtype=jnp.float32)

    logits = mtlr_forward(x, weight, bias, G)
    logits = jax.block_until_ready(logits)

    # Reference in plain JAX (same two-matmul math as the PyTorch forward).
    ref = (x @ weight + bias) @ G
    np.testing.assert_allclose(np.asarray(logits), np.asarray(ref),
                               rtol=1e-5, atol=1e-5)

    print("KERNEL_OK")
</pallas_src>

<mosaic_0001>
module attributes {stable_mosaic.version = 11 : i64} {
  func.func @mtlr_kernel(%arg0: i32, %arg1: memref<8x32xf32, #tpu.memory_space<vmem>>, %arg2: memref<32x128xf32, #tpu.memory_space<vmem>>, %arg3: memref<1x128xf32, #tpu.memory_space<vmem>>, %arg4: memref<8x128xf32, #tpu.memory_space<vmem>>) attributes {dimension_semantics = [#tpu.dimension_semantics<parallel>], iteration_bounds = array<i64: 1>, scalar_prefetch = 0 : i64, scratch_operands = 0 : i64, tpu.core_type = #tpu.core_type<tc>, window_params = [{transform_indices = @transform_0, window_bounds = array<i64: 8, 32>}, {pipeline_mode = #tpu.pipeline_mode<synchronous>, transform_indices = @transform_1, window_bounds = array<i64: 32, 128>}, {pipeline_mode = #tpu.pipeline_mode<synchronous>, transform_indices = @transform_2, window_bounds = array<i64: 1, 128>}, {transform_indices = @transform_3, window_bounds = array<i64: 8, 128>}]} {
    %c0 = arith.constant 0 : index
    %c0_0 = arith.constant 0 : index
    %0 = vector.load %arg1[%c0, %c0_0] : memref<8x32xf32, #tpu.memory_space<vmem>>, vector<8x32xf32>
    %c0_1 = arith.constant 0 : index
    %c0_2 = arith.constant 0 : index
    %1 = vector.load %arg2[%c0_1, %c0_2] : memref<32x128xf32, #tpu.memory_space<vmem>>, vector<32x128xf32>
    %cst = arith.constant dense<0.000000e+00> : vector<8x128xf32>
    %2 = tpu.matmul %0, %1, %cst {dimension_numbers = #tpu.dot_dimension_numbers<[1], [0], [0], [1], [0, 0, 1, 1], [], []>} : vector<8x32xf32>, vector<32x128xf32>, vector<8x128xf32> -> vector<8x128xf32>
    %c0_3 = arith.constant 0 : index
    %c0_4 = arith.constant 0 : index
    %3 = vector.load %arg3[%c0_3, %c0_4] : memref<1x128xf32, #tpu.memory_space<vmem>>, vector<1x128xf32>
    %4 = vector.broadcast %3 : vector<1x128xf32> to vector<8x128xf32>
    %5 = arith.addf %2, %4 : vector<8x128xf32>
    %c0_5 = arith.constant 0 : index
    %c0_6 = arith.constant 0 : index
    %6 = vector.load %arg4[%c0_5, %c0_6] : memref<8x128xf32, #tpu.memory_space<vmem>>, vector<8x128xf32>
    tpu.vector_store %arg4[%c0_5, %c0_6], %5 {strides = array<i32>} : memref<8x128xf32, #tpu.memory_space<vmem>>, vector<8x128xf32>,
    return
  }
  func.func @transform_0(%arg0: i32) -> (i32, i32) {
    %c0_i32 = arith.constant 0 : i32
    %c0_i32_0 = arith.constant 0 : i32
    return %arg0, %c0_i32 : i32, i32
  }
  func.func @transform_1(%arg0: i32) -> (i32, i32) {
    %c0_i32 = arith.constant 0 : i32
    %c0_i32_0 = arith.constant 0 : i32
    %c0_i32_1 = arith.constant 0 : i32
    return %c0_i32, %c0_i32_0 : i32, i32
  }
  func.func @transform_2(%arg0: i32) -> (i32, i32) {
    %c0_i32 = arith.constant 0 : i32
    %c0_i32_0 = arith.constant 0 : i32
    %c0_i32_1 = arith.constant 0 : i32
    return %c0_i32, %c0_i32_0 : i32, i32
  }
  func.func @transform_3(%arg0: i32) -> (i32, i32) {
    %c0_i32 = arith.constant 0 : i32
    %c0_i32_0 = arith.constant 0 : i32
    return %arg0, %c0_i32 : i32, i32
  }
}

</mosaic_0001>

<bundles_post_ra>
// kernel: mtlr_forward.1
= control target key start
LH: loop header
LB: loop body
LE: loop exit
PB: predicated region body
PF: predicated region fallthrough
CT: control target
= control target key end

     0   :  { %v132_v0 = vmov 0.0|0.0   ;;  %vm133_vm0 = vmmov 0   ;;  %v134_v4 = vmov 0.0   ;;  %vm26_vm1 = vcmask 261120   ;;  %s176_s1 = inlined_call_operand.vmem [shape: f32[32,128], index: 1, kind: input, shape index: {}]   ;;  %s177_s0 = inlined_call_operand.vmem [shape: f32[8,32], index: 0, kind: input, shape index: {}]   ;;  %s178_s2 = inlined_call_operand.vmem [shape: f32[1,128], index: 2, kind: input, shape index: {}]   ;;  %s179_s3 = inlined_call_operand.vmem [shape: f32[8,128], index: 3, kind: output, shape index: {}]  }
   0x1   :  { %123 = vmatprep.subr.bf16.mxu0 %v132_v0  ;;  %v15_v1 = vld [vmem:[%s176_s1] sm:$0xff]  ;;  %v16_v2 = vld [vmem:[%s176_s1 + $0x8] sm:$0xff]  ;;  %v17_v3 = vld [vmem:[%s176_s1 + $0x10] sm:$0xff]  ;;  %120 = vmatprep.mubr.msk.f32.mxu0 %vm133_vm0, %v134_v4 }
   0x2   :  { %v124_v5 = vpack.c.bf16 %v16_v2, %v15_v1  ;;  %v18_v6 = vld [vmem:[%s176_s1 + $0x18] sm:$0xff]  ;;  %v14_v8 = vld [vmem:[%s177_s0] sm:$0xff] }
   0x3   :  { %v127_v7 = vpack.c.bf16 %v18_v6, %v17_v3  ;;  %v105_v9 = vld [vmem:[%s178_s2] ss:$0 sm:$0xff] }
   0x4   :  { %125 = vmatpush3.bf16.msra.mxu0 %v124_v5 }
   0x5   :  { %126 = vmatprep.subr.bf16.mxu0 %v132_v0 }
   0x8   :  { %128 = vmatpush3.bf16.msra.mxu0 %v127_v7 }
   0xb   :  { %121 = vmatmul.mubr.msk.f32.vlgmr.msra.gmra.mrb[0].mxu0 %vm26_vm1, %v14_v8 }
  0xde   :  { %v96_v10 = vpop.f32.mrb[0].mxu0 }
  0xdf   :  { %v97_v11 = vadd.f32 %v105_v9, %v96_v10  ;;  %v122_v12 = vpop.f32.mrb[1].mxu0 }
  0xe1   :  { %100 = vst [vmem:[%s179_s3] sm:$0xff] %v97_v11 }

</bundles_post_ra>
